<compile_context>
chip_gen: v7x
topology: tpu7x:2x2x1
jax: 0.10.0
libtpu: 0.0.40
codegen_flags: <defaults>
</compile_context>

<pallas_src>
import functools

import jax
import jax.numpy as jnp
from jax.experimental import pallas as pl
from jax.experimental.pallas import tpu as pltpu

_LANES = 128


def _dice_partial_kernel(p_ref, t_ref, inter_ref, sumpt_ref, *,
                         rows_total, rows_tile, tiles_per_split):
    """Accumulate per-sample (intersection, sum(p+t)) (8,128) partials over row tiles."""
    s = pl.program_id(1)   # row-range split ("parallel", for v7x dual-TC when N is tiny)
    r = pl.program_id(2)   # row tile within the split ("arbitrary" reduction axis)

    @pl.when(r == 0)
    def _():
        inter_ref[...] = jnp.zeros_like(inter_ref)
        sumpt_ref[...] = jnp.zeros_like(sumpt_ref)

    p = p_ref[...].astype(jnp.float32)   # (1, rows_tile, 128), upcast hidden under DMA
    t = t_ref[...].astype(jnp.float32)

    groups = rows_tile // 8

    def accumulate(pv, tv):
        # Reduce only across whole (8,128) vreg tiles (VALU adds across vregs); keep the
        # (8,128) shape so the accumulator store is a full, unmasked vreg store and the
        # cross-sublane/lane reduction is left to the wrapper epilogue.
        pg = pv.reshape(groups, 8, _LANES)
        tg = tv.reshape(groups, 8, _LANES)
        inter_ref[...] += jnp.sum(pg * tg, axis=0)[None]
        sumpt_ref[...] += jnp.sum(pg + tg, axis=0)[None]   # fused sum(p) + sum(t)

    if rows_total % rows_tile == 0:
        # No ragged tile exists: common path is completely mask-free.
        accumulate(p, t)
    else:
        g = s * tiles_per_split + r          # global row-tile index
        is_last = (g + 1) * rows_tile > rows_total

        @pl.when(jnp.logical_not(is_last))
        def _():
            accumulate(p, t)

        @pl.when(is_last)
        def _():
            # Only the globally-last tile pays for iota + compare + select.
            row_id = g * rows_tile + jax.lax.broadcasted_iota(jnp.int32, p.shape, 1)
            valid = row_id < rows_total
            accumulate(jnp.where(valid, p, 0.0), jnp.where(valid, t, 0.0))


def _sublane_align(dtype):
    # Native TPU sublane tiling: (8,128) f32, (16,128) bf16/f16, (32,128) int8/bool.
    return max(8, 32 // max(1, jnp.asarray([], dtype).dtype.itemsize))


@functools.partial(jax.jit, static_argnames=("rows_tile", "n_splits"))
def soft_dice_loss(pred, targets, *, rows_tile=None, n_splits=None):
    """Pallas implementation of SoftDiceLoss.forward(pred, targets)."""
    num = targets.shape[0]
    smooth = jnp.float32(1.0)

    d = 1
    for s in pred.shape[1:]:
        d *= s

    m1 = pred.reshape(num, d)
    m2 = targets.reshape(num, d)

    d_main = (d // _LANES) * _LANES        # 128-aligned per-sample prefix
    rows = d_main // _LANES
    align = max(_sublane_align(pred.dtype), _sublane_align(targets.dtype))

    if rows < align:
        # Tiny-D fast path: grid-launch + epilogue overhead would dominate any kernel win.
        m1f = m1.astype(jnp.float32)
        m2f = m2.astype(jnp.float32)
        inter = jnp.sum(m1f * m2f, axis=1)
        sum_pt = jnp.sum(m1f + m2f, axis=1)
        score = 2.0 * (inter + smooth) / (sum_pt + smooth)
        return jnp.float32(1.0) - jnp.sum(score) / jnp.float32(num)

    # ---- tail (< 128 elems per sample) handled in plain jnp; no jnp.pad HBM pass ----
    if d_main < d:
        tail1 = m1[:, d_main:].astype(jnp.float32)
        tail2 = m2[:, d_main:].astype(jnp.float32)
        inter_tail = jnp.sum(tail1 * tail2, axis=1)
        sum_tail = jnp.sum(tail1 + tail2, axis=1)
        m1k = m1[:, :d_main]
        m2k = m2[:, :d_main]
        # TODO(synk): a fully zero-copy unaligned path would need manual DMA with
        # lane-masked final rows; the prefix slice here is still cheaper than jnp.pad.
    else:
        inter_tail = jnp.zeros((num,), jnp.float32)
        sum_tail = jnp.zeros((num,), jnp.float32)
        m1k = m1
        m2k = m2

    m1k = m1k.reshape(num, rows, _LANES)   # free, row-major contiguous reshape
    m2k = m2k.reshape(num, rows, _LANES)

    # ---- row tile: ~4 MiB per input block, rounded to the dtype sublane tiling ----
    itemsize = max(pred.dtype.itemsize, targets.dtype.itemsize)
    rows_down = (rows // align) * align    # >= align (guaranteed by fast-path gate)
    if rows_tile is None:
        rows_tile = (4 << 20) // (_LANES * itemsize)   # 8192 rows for f32
    rows_tile = max(align, (rows_tile // align) * align)
    rows_tile = min(rows_tile, rows_down)

    n_row_tiles = pl.cdiv(rows, rows_tile)

    # Optional row-range split so both v7x TensorCores stream HBM when N == 1.
    if n_splits is None:
        n_splits = 2 if (num == 1 and n_row_tiles >= 2 and n_row_tiles % 2 == 0) else 1
    if n_splits < 1 or n_row_tiles % n_splits != 0:
        n_splits = 1
    tiles_per_split = n_row_tiles // n_splits

    # Explicit VMEM budget: double-buffered input pipeline + generous margin, capped at
    # 48 MiB so it is safe on every generation (v7x has only 64 MiB physical VMEM).
    pipeline_bytes = 2 * rows_tile * _LANES * (pred.dtype.itemsize + targets.dtype.itemsize)
    vmem_limit = int(min(48 << 20, pipeline_bytes + (16 << 20)))

    kernel = functools.partial(
        _dice_partial_kernel,
        rows_total=rows,
        rows_tile=rows_tile,
        tiles_per_split=tiles_per_split,
    )

    inter_parts, sumpt_parts = pl.pallas_call(
        kernel,
        out_shape=(
            jax.ShapeDtypeStruct((num * n_splits, 8, _LANES), jnp.float32),
            jax.ShapeDtypeStruct((num * n_splits, 8, _LANES), jnp.float32),
        ),
        grid_spec=pltpu.PrefetchScalarGridSpec(
            num_scalar_prefetch=0,
            grid=(num, n_splits, tiles_per_split),
            in_specs=[
                pl.BlockSpec((1, rows_tile, _LANES),
                             lambda n, s, r: (n, s * tiles_per_split + r, 0)),
                pl.BlockSpec((1, rows_tile, _LANES),
                             lambda n, s, r: (n, s * tiles_per_split + r, 0)),
            ],
            out_specs=(
                pl.BlockSpec((1, 8, _LANES), lambda n, s, r: (n * n_splits + s, 0, 0)),
                pl.BlockSpec((1, 8, _LANES), lambda n, s, r: (n * n_splits + s, 0, 0)),
            ),
        ),
        compiler_params=pltpu.CompilerParams(
            dimension_semantics=("parallel", "parallel", "arbitrary"),
            vmem_limit_bytes=vmem_limit,
        ),
    )(m1k, m2k)

    inter = inter_parts.reshape(num, n_splits * 8 * _LANES).sum(axis=1) + inter_tail
    sum_pt = sumpt_parts.reshape(num, n_splits * 8 * _LANES).sum(axis=1) + sum_tail
    score = 2.0 * (inter + smooth) / (sum_pt + smooth)
    return jnp.float32(1.0) - jnp.sum(score) / jnp.float32(num)


def soft_dice_loss_ref(pred, targets):
    num = targets.shape[0]
    smooth = 1.0
    m1 = pred.reshape(num, -1).astype(jnp.float32)
    m2 = targets.reshape(num, -1).astype(jnp.float32)
    intersection = m1 * m2
    score = 2.0 * (intersection.sum(1) + smooth) / (m1.sum(1) + m2.sum(1) + smooth)
    return 1.0 - score.sum() / num


if __name__ == "__main__":
    key = jax.random.PRNGKey(0)
    k1, k2, k3, k4, k5, k6 = jax.random.split(key, 6)

    # Case 1: small segmentation head, 128-aligned D (N=2, C=4, H=W=16 -> D=1024, rows=8).
    pred = jax.nn.sigmoid(jax.random.normal(k1, (2, 4, 16, 16), dtype=jnp.float32))
    targets = (jax.random.uniform(k2, (2, 4, 16, 16)) > 0.5).astype(jnp.float32)
    loss = jax.block_until_ready(soft_dice_loss(pred, targets))
    ref = soft_dice_loss_ref(pred, targets)
    assert jnp.allclose(loss, ref, rtol=1e-5, atol=1e-5), (loss, ref)

    # Case 2: non-128-aligned D (D=1200 -> 1152-elem prefix in-kernel + 48-elem tail in
    # the wrapper) with a forced rows_tile=8 so the ragged-last-tile masked path runs.
    pred2 = jax.nn.sigmoid(jax.random.normal(k3, (2, 3, 20, 20), dtype=jnp.float32))
    targets2 = (jax.random.uniform(k4, (2, 3, 20, 20)) > 0.5).astype(jnp.float32)
    loss2 = jax.block_until_ready(soft_dice_loss(pred2, targets2, rows_tile=8))
    ref2 = soft_dice_loss_ref(pred2, targets2)
    assert jnp.allclose(loss2, ref2, rtol=1e-5, atol=1e-5), (loss2, ref2)

    # Case 3: N=1 with a forced small rows_tile so the dual-TensorCore row-split path
    # (n_splits=2) is exercised (D=4096 -> rows=32, rows_tile=16 -> 2 parallel splits).
    pred3 = jax.nn.sigmoid(jax.random.normal(k5, (1, 4, 32, 32), dtype=jnp.float32))
    targets3 = (jax.random.uniform(k6, (1, 4, 32, 32)) > 0.5).astype(jnp.float32)
    loss3 = jax.block_until_ready(soft_dice_loss(pred3, targets3, rows_tile=16))
    ref3 = soft_dice_loss_ref(pred3, targets3)
    assert jnp.allclose(loss3, ref3, rtol=1e-5, atol=1e-5), (loss3, ref3)

    print("KERNEL_OK")
</pallas_src>

<mosaic_0001>
module attributes {stable_mosaic.version = 11 : i64} {
  func.func @_dice_partial_kernel(%arg0: i32, %arg1: i32, %arg2: i32, %arg3: memref<1x8x128xf32, #tpu.memory_space<vmem>>, %arg4: memref<1x8x128xf32, #tpu.memory_space<vmem>>, %arg5: memref<1x8x128xf32, #tpu.memory_space<vmem>>, %arg6: memref<1x8x128xf32, #tpu.memory_space<vmem>>) attributes {dimension_semantics = [#tpu.dimension_semantics<parallel>, #tpu.dimension_semantics<parallel>, #tpu.dimension_semantics<arbitrary>], iteration_bounds = array<i64: 2, 1, 1>, scalar_prefetch = 0 : i64, scratch_operands = 0 : i64, tpu.core_type = #tpu.core_type<tc>, window_params = [{transform_indices = @transform_0, window_bounds = array<i64: 1, 8, 128>}, {transform_indices = @transform_1, window_bounds = array<i64: 1, 8, 128>}, {transform_indices = @transform_2, window_bounds = array<i64: 1, 8, 128>}, {transform_indices = @transform_3, window_bounds = array<i64: 1, 8, 128>}]} {
    %c0_i32 = arith.constant 0 : i32
    %0 = arith.cmpi eq, %arg2, %c0_i32 : i32
    %1 = arith.extui %0 : i1 to i32
    %c0_i32_0 = arith.constant 0 : i32
    %2 = arith.cmpi ne, %1, %c0_i32_0 : i32
    scf.if %2 {
      %cst_19 = arith.constant 0.000000e+00 : f32
      %17 = vector.broadcast %cst_19 : f32 to vector<1x8x128xf32>
      %c0_20 = arith.constant 0 : index
      %c0_21 = arith.constant 0 : index
      %c0_22 = arith.constant 0 : index
      %18 = vector.load %arg5[%c0_20, %c0_21, %c0_22] : memref<1x8x128xf32, #tpu.memory_space<vmem>>, vector<1x8x128xf32>
      tpu.vector_store %arg5[%c0_20, %c0_21, %c0_22], %17 {strides = array<i32>} : memref<1x8x128xf32, #tpu.memory_space<vmem>>, vector<1x8x128xf32>,
      %cst_23 = arith.constant 0.000000e+00 : f32
      %19 = vector.broadcast %cst_23 : f32 to vector<1x8x128xf32>
      %c0_24 = arith.constant 0 : index
      %c0_25 = arith.constant 0 : index
      %c0_26 = arith.constant 0 : index
      %20 = vector.load %arg6[%c0_24, %c0_25, %c0_26] : memref<1x8x128xf32, #tpu.memory_space<vmem>>, vector<1x8x128xf32>
      tpu.vector_store %arg6[%c0_24, %c0_25, %c0_26], %19 {strides = array<i32>} : memref<1x8x128xf32, #tpu.memory_space<vmem>>, vector<1x8x128xf32>,
    } else {
    }
    %c0 = arith.constant 0 : index
    %c0_1 = arith.constant 0 : index
    %c0_2 = arith.constant 0 : index
    %3 = vector.load %arg3[%c0, %c0_1, %c0_2] : memref<1x8x128xf32, #tpu.memory_space<vmem>>, vector<1x8x128xf32>
    %c0_3 = arith.constant 0 : index
    %c0_4 = arith.constant 0 : index
    %c0_5 = arith.constant 0 : index
    %4 = vector.load %arg4[%c0_3, %c0_4, %c0_5] : memref<1x8x128xf32, #tpu.memory_space<vmem>>, vector<1x8x128xf32>
    %c0_6 = arith.constant 0 : index
    %c0_7 = arith.constant 0 : index
    %c0_8 = arith.constant 0 : index
    %5 = vector.load %arg5[%c0_6, %c0_7, %c0_8] : memref<1x8x128xf32, #tpu.memory_space<vmem>>, vector<1x8x128xf32>
    %6 = arith.mulf %3, %4 : vector<1x8x128xf32>
    %cst = arith.constant dense<0.000000e+00> : vector<8x128xf32>
    %7 = vector.multi_reduction <add>, %6, %cst [0] : vector<1x8x128xf32> to vector<8x128xf32>
    %8 = vector.shape_cast %7 : vector<8x128xf32> to vector<1x8x128xf32>
    %9 = arith.addf %5, %8 : vector<1x8x128xf32>
    %c0_9 = arith.constant 0 : index
    %c0_10 = arith.constant 0 : index
    %c0_11 = arith.constant 0 : index
    %10 = vector.load %arg5[%c0_9, %c0_10, %c0_11] : memref<1x8x128xf32, #tpu.memory_space<vmem>>, vector<1x8x128xf32>
    tpu.vector_store %arg5[%c0_9, %c0_10, %c0_11], %9 {strides = array<i32>} : memref<1x8x128xf32, #tpu.memory_space<vmem>>, vector<1x8x128xf32>,
    %c0_12 = arith.constant 0 : index
    %c0_13 = arith.constant 0 : index
    %c0_14 = arith.constant 0 : index
    %11 = vector.load %arg6[%c0_12, %c0_13, %c0_14] : memref<1x8x128xf32, #tpu.memory_space<vmem>>, vector<1x8x128xf32>
    %12 = arith.addf %3, %4 : vector<1x8x128xf32>
    %cst_15 = arith.constant dense<0.000000e+00> : vector<8x128xf32>
    %13 = vector.multi_reduction <add>, %12, %cst_15 [0] : vector<1x8x128xf32> to vector<8x128xf32>
    %14 = vector.shape_cast %13 : vector<8x128xf32> to vector<1x8x128xf32>
    %15 = arith.addf %11, %14 : vector<1x8x128xf32>
    %c0_16 = arith.constant 0 : index
    %c0_17 = arith.constant 0 : index
    %c0_18 = arith.constant 0 : index
    %16 = vector.load %arg6[%c0_16, %c0_17, %c0_18] : memref<1x8x128xf32, #tpu.memory_space<vmem>>, vector<1x8x128xf32>
    tpu.vector_store %arg6[%c0_16, %c0_17, %c0_18], %15 {strides = array<i32>} : memref<1x8x128xf32, #tpu.memory_space<vmem>>, vector<1x8x128xf32>,
    return
  }
  func.func @transform_0(%arg0: i32, %arg1: i32, %arg2: i32) -> (i32, i32, i32) {
    %c1_i32 = arith.constant 1 : i32
    %0 = arith.muli %arg1, %c1_i32 : i32
    %1 = arith.addi %0, %arg2 : i32
    %c0_i32 = arith.constant 0 : i32
    %c0_i32_0 = arith.constant 0 : i32
    return %arg0, %1, %c0_i32 : i32, i32, i32
  }
  func.func @transform_1(%arg0: i32, %arg1: i32, %arg2: i32) -> (i32, i32, i32) {
    %c1_i32 = arith.constant 1 : i32
    %0 = arith.muli %arg1, %c1_i32 : i32
    %1 = arith.addi %0, %arg2 : i32
    %c0_i32 = arith.constant 0 : i32
    %c0_i32_0 = arith.constant 0 : i32
    return %arg0, %1, %c0_i32 : i32, i32, i32
  }
  func.func @transform_2(%arg0: i32, %arg1: i32, %arg2: i32) -> (i32, i32, i32) {
    %c1_i32 = arith.constant 1 : i32
    %0 = arith.muli %arg0, %c1_i32 : i32
    %1 = arith.addi %0, %arg1 : i32
    %c0_i32 = arith.constant 0 : i32
    %c0_i32_0 = arith.constant 0 : i32
    %c0_i32_1 = arith.constant 0 : i32
    return %1, %c0_i32, %c0_i32_0 : i32, i32, i32
  }
  func.func @transform_3(%arg0: i32, %arg1: i32, %arg2: i32) -> (i32, i32, i32) {
    %c1_i32 = arith.constant 1 : i32
    %0 = arith.muli %arg0, %c1_i32 : i32
    %1 = arith.addi %0, %arg1 : i32
    %c0_i32 = arith.constant 0 : i32
    %c0_i32_0 = arith.constant 0 : i32
    %c0_i32_1 = arith.constant 0 : i32
    return %1, %c0_i32, %c0_i32_0 : i32, i32, i32
  }
}

</mosaic_0001>

<bundles_post_ra>
// kernel: soft_dice_loss.1
= control target key start
LH: loop header
LB: loop body
LE: loop exit
PB: predicated region body
PF: predicated region fallthrough
CT: control target
= control target key end

     0   :  { %s477_s12 = smov 0   ;;  %s479_s13 = smov 0   ;;  %s504_s0 = inlined_call_operand.vmem [shape: f32[2,8,128], index: 0, kind: input, shape index: {}]   ;;  %s505_s1 = inlined_call_operand.vmem [shape: f32[2,8,128], index: 1, kind: input, shape index: {}]   ;;  %s506_s2 = inlined_call_operand.vmem [shape: f32[2,8,128], index: 2, kind: output, shape index: {0}]   ;;  %s507_s3 = inlined_call_operand.vmem [shape: f32[2,8,128], index: 3, kind: output, shape index: {1}]  }
   0x1   :  { %s481_s14 = smov 0  }
   0x2 LB: > { %s33_s15 = sadd.s32 1, %s451_s13  ;;  %p401_p0 = scmp.ge.s32.totalorder %s455_s14, 1  ;;  %s455_s14 = sphi %s481_s14, %s14_s14   ;;  %s451_s13 = sphi %s479_s13, %s509_s13   ;;  %s447_s12 = sphi %s477_s12, %s508_s12  }
   0x3   : > { %p35_p1 = scmp.ge.s32.totalorder %s33_s15, 2  ;;  %p189_p2 = scmp.lt.s32.totalorder %s455_s14, 3 }
   0x5   : > { %s511_s15 = smov (%p35_p1, %s33_s15), 0  ;;  %p190_p3 = pnand %p401_p0, %p189_p2 }
   0x6   : > { %p230_p4 = scmp.lt.s32.totalorder (!%p190_p3), %s447_s12, 1 }
   0x7   : > { %193 = sbr.rel (%p190_p3) target bundleno = 22 (0x16), region = 28 }
   0xe   : > { %s513_s12 = smov (!%p230_p4, %s447_s12), 1 }
   0xf   : > { %s402_s16 = sshll.u32 %s513_s12, 3 }
  0x10   : > { %s236_s19 = scalar_lea.vmem %s504_s0, %s402_s16  ;;  %s245_s22 = scalar_lea.vmem %s505_s1, %s402_s16 }
  0x11   : > { %v265_v0 = vld [vmem:[%s236_s19] sm:$0xff]  ;;  %s251_s25 = scalar_lea.vmem %s506_s2, %s402_s16  ;;  %s257_s28 = scalar_lea.vmem %s507_s3, %s402_s16 }
  0x12   : > { %v266_v1 = vld [vmem:[%s245_s22] sm:$0xff] }
  0x13   : > { %v268_v2 = vmul.f32 %v266_v1, %v265_v0  ;;  %v273_v3 = vadd.f32 %v266_v1, %v265_v0 }
  0x15   : > { %271 = vst [vmem:[%s251_s25] sm:$0xff] %v268_v2  ;;  %276 = vst [vmem:[%s257_s28] sm:$0xff] %v273_v3 }
  0x16 PF: > { %s14_s14 = sadd.s32 1, %s455_s14   ;;  %s508_s12 = smov %s451_s13 }
  0x17   : > { %p11_p5 = scmp.ge.s32.totalorder %s14_s14, 4   ;;  %s509_s13 = smov %s511_s15 }
  0x19   :  { %13 = sbr.rel (!%p11_p5) target bundleno = 2 (0x2), region = 77 }

</bundles_post_ra>
